<compile_context>
chip_gen: v5e
topology: v5e:2x2
jax: 0.10.0
libtpu: 0.0.40
codegen_flags: <defaults>
</compile_context>

<pallas_src>
import functools
import math

import jax
import jax.numpy as jnp
import numpy as np
from jax.experimental import pallas as pl
from jax.experimental.pallas import tpu as pltpu


def _cdiv(a, b):
    return -(-a // b)


def _round_up(a, b):
    return _cdiv(a, b) * b


def _vmem_capacity_bytes():
    try:
        return int(pltpu.get_tpu_info().vmem_capacity_bytes)
    except Exception:
        return 64 << 20  # conservative default (v7x per-TensorCore VMEM)


def _num_tensorcores():
    try:
        d = jax.devices()[0]
        for attr in ("num_cores", "core_count", "num_cores_per_chip"):
            v = getattr(d, attr, None)
            if isinstance(v, int) and 0 < v <= 16:
                return v
    except Exception:
        pass
    return 1


def _grid_gaussian_kernel(loc_ref, ygrid_ref, xgrid_ref, out_ref, *,
                          inv_two_var, mean_value):
    # loc_ref  : (TB, 1, 2)   packed per-batch [y, x]
    # ygrid_ref: (1, h, 1)    grid row coordinates (resident)
    # xgrid_ref: (1, 1, w)    grid column coordinates (resident)
    y = loc_ref[:, :, 0:1]                               # (TB, 1, 1) lane slice
    x = loc_ref[:, :, 1:2]                               # (TB, 1, 1) lane slice
    dy = ygrid_ref[...] - y                              # (TB, h, 1)
    dx = xgrid_ref[...] - x                              # (TB, 1, w)
    ey = jnp.exp(dy * dy * (-inv_two_var)) * mean_value  # (TB, h, 1)
    ex = jnp.exp(dx * dx * (-inv_two_var))               # (TB, 1, w)
    # Separable combine: unit-lane broadcast of ey, unit-sublane broadcast of ex.
    out_ref[...] = (ey * ex).astype(out_ref.dtype)


def make_grid_gaussian(variance, h, w, hmin, hmax, wmin, wmax, mean_value=None):
    """Builds the constant grids (analogue of the nn.Parameter in __init__)."""
    if mean_value is None:
        mean_value = 1.0 / (2.0 * math.pi * variance)
    ys = np.linspace(hmin, hmax, h).astype(np.float32)   # (h,)
    xs = np.linspace(wmin, wmax, w).astype(np.float32)   # (w,)
    ones = np.ones((h, w), np.float32)
    linear_grid = np.concatenate([(ys[:, None] * ones)[None],
                                  (xs[None, :] * ones)[None]], 0)  # (2, h, w)
    return dict(
        variance=float(variance),
        mean_value=float(mean_value),
        h=int(h), w=int(w),
        ygrid=jnp.asarray(ys).reshape(1, h, 1),
        xgrid=jnp.asarray(xs).reshape(1, 1, w),
        linear_grid=jnp.asarray(linear_grid),
    )


def _pick_batch_tile(n, h, w, out_itemsize, vmem_cap, cores):
    """Pick (tb, n_pad): big tiles (~8 MiB output), generation-aware VMEM
    budget, prefer tb | n (no padding, no post-kernel slice copy), and keep
    >= 2*cores grid steps on multi-TensorCore chips for large batches."""
    coord_row = 4096                              # (1,2) f32 pads to one (8,128) tile
    out_row = h * w * out_itemsize
    total_budget = min(36 << 20, (vmem_cap * 3) // 5)
    cap_rows = max(1, total_budget // (2 * (out_row + coord_row)))
    cap_rows = min(cap_rows, max(1, (8 << 20) // out_row))   # no gain past ~8 MiB tiles

    min_steps = 1
    if cores > 1 and n > cores:
        min_steps = min(2 * cores, n)
    steps = max(_cdiv(n, cap_rows), min_steps)

    if steps <= 1:
        return n, n
    tb0 = _cdiv(n, steps)
    tb = tb0
    lo = max(1, (2 * tb0) // 3)
    for cand in range(tb0, lo - 1, -1):          # prefer exact divisor: no padding
        if n % cand == 0:
            tb = cand
            break
    n_pad = _round_up(n, tb)
    return tb, n_pad


def grid_gaussian(loc, params, *, out_dtype=jnp.float32, block_batch=None):
    """Pallas forward. loc: (..., 2) with loc[...] = [y, x]. Returns (..., h, w)."""
    h, w = params["h"], params["w"]
    assert loc.shape[-1] == 2, loc.shape
    batch_shape = loc.shape[:-1]
    n = 1
    for d in batch_shape:
        n *= int(d)
    if n == 0:
        return jnp.zeros((*batch_shape, h, w), out_dtype)

    out_itemsize = jnp.dtype(out_dtype).itemsize
    vmem_cap = _vmem_capacity_bytes()
    cores = _num_tensorcores()

    if block_batch is None:
        tb, n_pad = _pick_batch_tile(n, h, w, out_itemsize, vmem_cap, cores)
    else:
        tb = max(1, int(block_batch))
        n_pad = _round_up(n, tb)

    loc_flat = loc.reshape(n, 2).astype(jnp.float32)
    if n_pad != n:
        loc_flat = jnp.pad(loc_flat, ((0, n_pad - n), (0, 0)))
    loc_packed = loc_flat.reshape(n_pad, 1, 2)            # single packed coord stream

    # Explicit VMEM limit: double-buffered output + coord blocks + resident grids.
    grids_bytes = 2 * (_round_up(h, 8) * 128 * 4 + 8 * _round_up(w, 128) * 4)
    need_bytes = 2 * tb * (h * w * out_itemsize + 4096) + grids_bytes
    vmem_limit = max(16 << 20, need_bytes + (6 << 20))
    vmem_limit = min(vmem_limit, max(vmem_cap - (8 << 20), need_bytes + (1 << 20)))

    cost = pl.CostEstimate(
        flops=int(n_pad) * (h * w + 4 * (h + w)),
        transcendentals=int(n_pad) * (h + w),
        bytes_accessed=int(n_pad) * (h * w * out_itemsize + 8) + (h + w) * 4,
    )

    kernel = functools.partial(
        _grid_gaussian_kernel,
        inv_two_var=1.0 / (2.0 * params["variance"]),
        mean_value=params["mean_value"])

    out = pl.pallas_call(
        kernel,
        out_shape=jax.ShapeDtypeStruct((n_pad, h, w), out_dtype),
        grid=(n_pad // tb,),
        in_specs=[
            pl.BlockSpec((tb, 1, 2), lambda b: (b, 0, 0)),   # packed [y, x]
            pl.BlockSpec((1, h, 1), lambda b: (0, 0, 0)),    # y grid (resident)
            pl.BlockSpec((1, 1, w), lambda b: (0, 0, 0)),    # x grid (resident)
        ],
        out_specs=pl.BlockSpec((tb, h, w), lambda b: (b, 0, 0)),
        compiler_params=pltpu.CompilerParams(
            dimension_semantics=("parallel",),
            vmem_limit_bytes=int(vmem_limit)),
        cost_estimate=cost,
    )(loc_packed, params["ygrid"], params["xgrid"])

    if n_pad != n:
        out = out[:n]
    return out.reshape(*batch_shape, h, w)


def grid_gaussian_ref(loc, linear_grid, variance, mean_value):
    """Pure-JAX reference mirroring the PyTorch forward exactly."""
    loc_grid = loc[..., None, None]                       # (..., 2, 1, 1)
    diff = linear_grid - loc_grid                         # (..., 2, h, w)
    return jnp.exp(-(diff * diff).sum(axis=-3) / (2.0 * variance)) * mean_value


if __name__ == "__main__":
    variance = 0.05
    h, w = 16, 128                       # lane-dense output (w = 128)
    hmin, hmax, wmin, wmax = -1.0, 1.0, -1.5, 1.5

    params = make_grid_gaussian(variance, h, w, hmin, hmax, wmin, wmax)

    key = jax.random.PRNGKey(0)
    loc = jax.random.uniform(key, (2, 3, 2), jnp.float32,
                             minval=-1.0, maxval=1.0)    # [..., 2] = [y, x]
    ref = grid_gaussian_ref(loc, params["linear_grid"], variance,
                            params["mean_value"])

    # 1) auto-tiled f32 path (single step, no padding, no output slice)
    out = jax.block_until_ready(grid_gaussian(loc, params))
    assert out.shape == (2, 3, h, w), out.shape
    assert jnp.allclose(out, ref, atol=1e-5, rtol=1e-5), (
        float(jnp.max(jnp.abs(out - ref))))

    # 2) multi-step grid path (block divides n -> no padding)
    out2 = jax.block_until_ready(grid_gaussian(loc, params, block_batch=2))
    assert jnp.allclose(out2, ref, atol=1e-5, rtol=1e-5)

    # 3) ragged path (padding + tail slice)
    out3 = jax.block_until_ready(grid_gaussian(loc, params, block_batch=4))
    assert jnp.allclose(out3, ref, atol=1e-5, rtol=1e-5)

    # 4) bf16 output path (halves HBM writeback for the store-bound kernel)
    out_bf16 = jax.block_until_ready(
        grid_gaussian(loc, params, out_dtype=jnp.bfloat16))
    assert out_bf16.dtype == jnp.bfloat16
    assert jnp.allclose(out_bf16.astype(jnp.float32), ref, atol=5e-2)

    # 5) larger batch exercising the auto-sizer (still tiny overall)
    loc_big = jax.random.uniform(jax.random.PRNGKey(0), (5, 8, 2), jnp.float32,
                                 minval=-1.0, maxval=1.0)
    ref_big = grid_gaussian_ref(loc_big, params["linear_grid"], variance,
                                params["mean_value"])
    out_big = jax.block_until_ready(grid_gaussian(loc_big, params))
    assert jnp.allclose(out_big, ref_big, atol=1e-5, rtol=1e-5)

    print("KERNEL_OK")
</pallas_src>

<mosaic_0001>
module attributes {stable_mosaic.version = 11 : i64} {
  func.func @_grid_gaussian_kernel(%arg0: i32, %arg1: memref<6x1x2xf32, #tpu.memory_space<vmem>>, %arg2: memref<1x16x1xf32, #tpu.memory_space<vmem>>, %arg3: memref<1x1x128xf32, #tpu.memory_space<vmem>>, %arg4: memref<6x16x128xf32, #tpu.memory_space<vmem>>) attributes {dimension_semantics = [#tpu.dimension_semantics<parallel>], iteration_bounds = array<i64: 1>, scalar_prefetch = 0 : i64, scratch_operands = 0 : i64, tpu.core_type = #tpu.core_type<tc>, window_params = [{transform_indices = @transform_0, window_bounds = array<i64: 6, 1, 2>}, {pipeline_mode = #tpu.pipeline_mode<synchronous>, transform_indices = @transform_1, window_bounds = array<i64: 1, 16, 1>}, {pipeline_mode = #tpu.pipeline_mode<synchronous>, transform_indices = @transform_2, window_bounds = array<i64: 1, 1, 128>}, {transform_indices = @transform_3, window_bounds = array<i64: 6, 16, 128>}]} {
    %c0 = arith.constant 0 : index
    %c0_0 = arith.constant 0 : index
    %c0_1 = arith.constant 0 : index
    %0 = vector.load %arg1[%c0, %c0_0, %c0_1] : memref<6x1x2xf32, #tpu.memory_space<vmem>>, vector<6x1x1xf32>
    %c0_2 = arith.constant 0 : index
    %c0_3 = arith.constant 0 : index
    %c1 = arith.constant 1 : index
    %1 = vector.load %arg1[%c0_2, %c0_3, %c1] : memref<6x1x2xf32, #tpu.memory_space<vmem>>, vector<6x1x1xf32>
    %c0_4 = arith.constant 0 : index
    %c0_5 = arith.constant 0 : index
    %c0_6 = arith.constant 0 : index
    %2 = vector.load %arg2[%c0_4, %c0_5, %c0_6] : memref<1x16x1xf32, #tpu.memory_space<vmem>>, vector<1x16x1xf32>
    %3 = vector.broadcast %2 : vector<1x16x1xf32> to vector<6x16x1xf32>
    %4 = vector.broadcast %0 : vector<6x1x1xf32> to vector<6x16x1xf32>
    %5 = arith.subf %3, %4 : vector<6x16x1xf32>
    %c0_7 = arith.constant 0 : index
    %c0_8 = arith.constant 0 : index
    %c0_9 = arith.constant 0 : index
    %6 = vector.load %arg3[%c0_7, %c0_8, %c0_9] : memref<1x1x128xf32, #tpu.memory_space<vmem>>, vector<1x1x128xf32>
    %7 = vector.broadcast %6 : vector<1x1x128xf32> to vector<6x1x128xf32>
    %8 = vector.broadcast %1 : vector<6x1x1xf32> to vector<6x1x128xf32>
    %9 = arith.subf %7, %8 : vector<6x1x128xf32>
    %10 = arith.mulf %5, %5 : vector<6x16x1xf32>
    %cst = arith.constant -1.000000e+01 : f32
    %11 = vector.broadcast %cst : f32 to vector<6x16x1xf32>
    %12 = arith.mulf %10, %11 : vector<6x16x1xf32>
    %13 = math.exp %12 : vector<6x16x1xf32>
    %cst_10 = arith.constant 3.18309879 : f32
    %14 = vector.broadcast %cst_10 : f32 to vector<6x16x1xf32>
    %15 = arith.mulf %13, %14 : vector<6x16x1xf32>
    %16 = arith.mulf %9, %9 : vector<6x1x128xf32>
    %cst_11 = arith.constant -1.000000e+01 : f32
    %17 = vector.broadcast %cst_11 : f32 to vector<6x1x128xf32>
    %18 = arith.mulf %16, %17 : vector<6x1x128xf32>
    %19 = math.exp %18 : vector<6x1x128xf32>
    %20 = vector.broadcast %15 : vector<6x16x1xf32> to vector<6x16x128xf32>
    %21 = vector.broadcast %19 : vector<6x1x128xf32> to vector<6x16x128xf32>
    %22 = arith.mulf %20, %21 : vector<6x16x128xf32>
    %c0_12 = arith.constant 0 : index
    %c0_13 = arith.constant 0 : index
    %c0_14 = arith.constant 0 : index
    %23 = vector.load %arg4[%c0_12, %c0_13, %c0_14] : memref<6x16x128xf32, #tpu.memory_space<vmem>>, vector<6x16x128xf32>
    tpu.vector_store %arg4[%c0_12, %c0_13, %c0_14], %22 {strides = array<i32>} : memref<6x16x128xf32, #tpu.memory_space<vmem>>, vector<6x16x128xf32>,
    return
  }
  func.func @transform_0(%arg0: i32) -> (i32, i32, i32) {
    %c0_i32 = arith.constant 0 : i32
    %c0_i32_0 = arith.constant 0 : i32
    %c0_i32_1 = arith.constant 0 : i32
    return %arg0, %c0_i32, %c0_i32_0 : i32, i32, i32
  }
  func.func @transform_1(%arg0: i32) -> (i32, i32, i32) {
    %c0_i32 = arith.constant 0 : i32
    %c0_i32_0 = arith.constant 0 : i32
    %c0_i32_1 = arith.constant 0 : i32
    %c0_i32_2 = arith.constant 0 : i32
    return %c0_i32, %c0_i32_0, %c0_i32_1 : i32, i32, i32
  }
  func.func @transform_2(%arg0: i32) -> (i32, i32, i32) {
    %c0_i32 = arith.constant 0 : i32
    %c0_i32_0 = arith.constant 0 : i32
    %c0_i32_1 = arith.constant 0 : i32
    %c0_i32_2 = arith.constant 0 : i32
    return %c0_i32, %c0_i32_0, %c0_i32_1 : i32, i32, i32
  }
  func.func @transform_3(%arg0: i32) -> (i32, i32, i32) {
    %c0_i32 = arith.constant 0 : i32
    %c0_i32_0 = arith.constant 0 : i32
    %c0_i32_1 = arith.constant 0 : i32
    return %arg0, %c0_i32, %c0_i32_0 : i32, i32, i32
  }
}

</mosaic_0001>

<bundles_post_ra>
// kernel: tpu_custom_call.1
= control target key start
LH: loop header
LB: loop body
LE: loop exit
PB: predicated region body
PF: predicated region fallthrough
CT: control target
= control target key end

     0   :  { %v373_v3 = vmov 1   ;;  %s457_s0 = inlined_call_operand.vmem [shape: f32[6,1,2], index: 0, kind: input, shape index: {}]   ;;  %s458_s1 = inlined_call_operand.vmem [shape: f32[1,16,1], index: 1, kind: input, shape index: {}]   ;;  %s459_s2 = inlined_call_operand.vmem [shape: f32[1,1,128], index: 2, kind: input, shape index: {}]   ;;  %s460_s3 = inlined_call_operand.hbm [shape: f32[6,16,128], index: 3, kind: output, shape index: {}]  }
   0x1   :  { %v17_v0 = vld [vmem:[%s457_s0 + $0x2] sm:$0x1]  ;;  %v22_v2 = vld [vmem:[%s458_s1 + $0x8] sm:$0xff]  ;;  %300 = vset.pattern.permute.xlu1 %v373_v3  ;;  %299 = vset.pattern.permute.xlu0 %v373_v3  ;;  %v15_v5 = vld [vmem:[%s457_s0] sm:$0x1] }
   0x2   :  { %v404_v1 = vld [vmem:[%s458_s1] sm:$0xff]  ;;  %301 = vset.pattern.permute.xlu2 %v373_v3  ;;  %65 = vperm.xlu1 %300, %v17_v0  }
   0x3   :  { %v305_v4 = vld [vmem:[%s457_s0 + $0x2] ss:$0 sm:$0xff]  ;;  %v306_v6 = vld [vmem:[%s457_s0] ss:$0 sm:$0xff]  ;;  %v19_v7 = vld [vmem:[%s457_s0 + $0x4] sm:$0x1]  ;;  %55 = vperm.xlu0 %299, %v15_v5  }
   0x4   :  { %v46_v8 = vsub.f32 %v22_v2, %v305_v4  ;;  %v41_v9 = vsub.f32 %v404_v1, %v306_v6  ;;  %v42_v10 = vsub.f32 %v22_v2, %v306_v6  ;;  %v45_v11 = vsub.f32 %v404_v1, %v305_v4  ;;  %75 = vperm.xlu2 %301, %v19_v7   ;;  %v307_v12 = vld [vmem:[%s457_s0 + $0x4] ss:$0 sm:$0xff] }
   0x5   :  { %8 = vsyncpa [#allocation3], 0  ;;  %v309_v16 = vld [vmem:[%s457_s0 + $0x1] ss:$0 sm:$0xff]  ;;  %v308_v17 = vld [vmem:[%s457_s0 + $0x3] ss:$0 sm:$0xff]  ;;  %v49_v23 = vsub.f32 %v404_v1, %v307_v12  ;;  %v50_v47 = vsub.f32 %v22_v2, %v307_v12 }
   0x6   :  { %v95_v13 = vmul.f32 %v46_v8, %v46_v8  ;;  %v90_v14 = vmul.f32 %v41_v9, %v41_v9  ;;  %v91_v15 = vmul.f32 %v42_v10, %v42_v10  ;;  %v18_v20 = vld [vmem:[%s457_s0 + $0x3] sm:$0x1]  ;;  %v94_v21 = vmul.f32 %v45_v11, %v45_v11  ;;  %v16_v24 = vld [vmem:[%s457_s0 + $0x1] sm:$0x1]  ;;  %v20_v27 = vld [vmem:[%s457_s0 + $0x5] sm:$0x1] }
   0x7   :  { %v43_v26 = vsub.f32 %v404_v1, %v309_v16  ;;  %v47_v29 = vsub.f32 %v404_v1, %v308_v17  ;;  %v44_v30 = vsub.f32 %v22_v2, %v309_v16  ;;  %v98_v34 = vmul.f32 %v49_v23, %v49_v23  ;;  %v310_v38 = vld [vmem:[%s457_s0 + $0x5] ss:$0 sm:$0xff]  ;;  %s282_s16 = sshll.u32 %s460_s3, 4  ;;  %s376_s17 = smov 128   ;;  %s283_s16 = int_to_ptr.hbm [resolvable:$true] %s282_s16 }
   0x8   :  { %v102_v18 = vmul.f32 -10.0, %v90_v14  ;;  %v103_v19 = vmul.f32 -10.0, %v91_v15  ;;  %v107_v22 = vmul.f32 -10.0, %v95_v13  ;;  %v106_v32 = vmul.f32 -10.0, %v94_v21  ;;  %s377_s18 = smov 8  }
   0x9   :  { %v92_v31 = vmul.f32 %v43_v26, %v43_v26  ;;  %v93_v35 = vmul.f32 %v44_v30, %v44_v30  ;;  %v48_v36 = vsub.f32 %v22_v2, %v308_v17  ;;  %v96_v39 = vmul.f32 %v47_v29, %v47_v29 }
   0xa   :  { %v114_v25 = vmul.f32 1.442695, %v102_v18  ;;  %v116_v28 = vmul.f32 1.442695, %v103_v19  ;;  %70 = vperm.xlu1 %300, %v18_v20   ;;  %v124_v33 = vmul.f32 1.442695, %v107_v22  ;;  %v52_v46 = vsub.f32 %v22_v2, %v310_v38 }
   0xb   :  { %60 = vperm.xlu0 %299, %v16_v24   ;;  %v104_v37 = vmul.f32 -10.0, %v92_v31  ;;  %v105_v40 = vmul.f32 -10.0, %v93_v35  ;;  %v122_v42 = vmul.f32 1.442695, %v106_v32  ;;  %v110_v43 = vmul.f32 -10.0, %v98_v34 }
   0xc   :  { %80 = vperm.xlu2 %301, %v20_v27   ;;  %311 = vpow2.f32 %v114_v25  ;;  %v97_v45 = vmul.f32 %v48_v36, %v48_v36  ;;  %v108_v48 = vmul.f32 -10.0, %v96_v39  ;;  %v374_v49 = vmov 0   ;;  %v53_v27 = vld [vmem:[%s459_s2] sm:$0x1]  ;;  %s375_s2 = smov [#allocation2]  }
   0xd   :  { %313 = vpow2.f32 %v116_v28  ;;  %v118_v41 = vmul.f32 1.442695, %v104_v37  ;;  %v120_v44 = vmul.f32 1.442695, %v105_v40  ;;  %v130_v52 = vmul.f32 1.442695, %v110_v43 }
   0xe   :  { %315 = vpow2.f32 %v124_v33  ;;  %v109_v54 = vmul.f32 -10.0, %v97_v45  ;;  %v51_v55 = vsub.f32 %v404_v1, %v310_v38  ;;  %v101_v56 = vmul.f32 %v52_v46, %v52_v46  ;;  %s280_s13 = sshll.u32 %s375_s2, 4  ;;  %s281_s13 = int_to_ptr.vmem [resolvable:$true] %s280_s13 }
   0xf   :  { %317 = vpow2.f32 %v118_v41  ;;  %v99_v59 = vmul.f32 %v50_v47, %v50_v47  ;;  %v126_v60 = vmul.f32 1.442695, %v108_v48 }
  0x10   :  { %319 = vpow2.f32 %v120_v44  ;;  %v100_v0 = vmul.f32 %v51_v55, %v51_v55  ;;  %v113_v2 = vmul.f32 -10.0, %v101_v56  ;;  %v128_v3 = vmul.f32 1.442695, %v109_v54 }
  0x11   :  { %321 = vpow2.f32 %v122_v42  ;;  %v111_v5 = vmul.f32 -10.0, %v99_v59 }
  0x12   :  { %303 = vset.pattern.permute.xlu1 %v374_v49  ;;  %v312_v50 = vpop.eup %311  ;;  %323 = vpow2.f32 %v130_v52  ;;  %v112_v7 = vmul.f32 -10.0, %v100_v0  ;;  %v136_v8 = vmul.f32 1.442695, %v113_v2 }
  0x13   :  { %302 = vset.pattern.permute.xlu0 %v374_v49  ;;  %v314_v51 = vpop.eup %313  ;;  %v138_v53 = vmul.f32 3.1830988, %v312_v50  ;;  %325 = vpow2.f32 %v126_v60  ;;  %v132_v9 = vmul.f32 1.442695, %v111_v5 }
  0x14   :  { %304 = vset.pattern.permute.xlu2 %v374_v49  ;;  %v139_v57 = vmul.f32 3.1830988, %v314_v51  ;;  %v316_v58 = vpop.eup %315  ;;  %327 = vpow2.f32 %v128_v3  ;;  %v134_v13 = vmul.f32 1.442695, %v112_v7 }
  0x15   :  { %176 = vperm.xlu0 %302, %v138_v53   ;;  %v318_v61 = vpop.eup %317  ;;  %v143_v6 = vmul.f32 3.1830988, %v316_v58  ;;  %329 = vpow2.f32 %v136_v8 }
  0x16   :  { %181 = vperm.xlu1 %303, %v139_v57   ;;  %v320_v62 = vpop.eup %319  ;;  %v140_v63 = vmul.f32 3.1830988, %v318_v61  ;;  %331 = vpow2.f32 %v132_v9 }
  0x17   :  { %v322_v4 = vpop.eup %321  ;;  %v141_v1 = vmul.f32 3.1830988, %v320_v62  ;;  %333 = vpow2.f32 %v134_v13 }
  0x18   :  { %186 = vperm.xlu2 %304, %v140_v63   ;;  %v142_v10 = vmul.f32 3.1830988, %v322_v4  ;;  %v324_v11 = vpop.eup %323 }
  0x19   :  { %v326_v12 = vpop.eup %325  ;;  %v146_v14 = vmul.f32 3.1830988, %v324_v11 }
  0x1a   :  { %v328_v15 = vpop.eup %327  ;;  %v144_v16 = vmul.f32 3.1830988, %v326_v12 }
  0x1b   :  { %v145_v17 = vmul.f32 3.1830988, %v328_v15  ;;  %v330_v18 = vpop.eup %329 }
  0x1c   :  { %v332_v19 = vpop.eup %331  ;;  %v149_v20 = vmul.f32 3.1830988, %v330_v18 }
  0x1d   :  { %201 = vperm.xlu0 %302, %v143_v6   ;;  %v334_v21 = vpop.eup %333  ;;  %v147_v22 = vmul.f32 3.1830988, %v332_v19 }
  0x1e   :  { %191 = vperm.xlu1 %303, %v141_v1   ;;  %v148_v23 = vmul.f32 3.1830988, %v334_v21 }
  0x20   :  { %196 = vperm.xlu2 %304, %v142_v10  }
  0x25   :  { %216 = vperm.xlu0 %302, %v146_v14  }
  0x26   :  { %206 = vperm.xlu1 %303, %v144_v16  }
  0x28   :  { %211 = vperm.xlu2 %304, %v145_v17  }
  0x2d   :  { %231 = vperm.xlu0 %302, %v149_v20  }
  0x2e   :  { %221 = vperm.xlu1 %303, %v147_v22  }
  0x30   :  { %226 = vperm.xlu2 %304, %v148_v23  }
  0x5e   :  { %v76_v24 = vpop.permute.xlu2 %75 }
  0x5f   :  { %v78_v39 = vperm.slane %v76_v24, 0 }
  0x61   :  { %v88_v49 = vsub.f32 %v53_v27, %v78_v39 }
  0x63   :  { %v154_v55 = vmul.f32 %v88_v49, %v88_v49 }
  0x65   :  { %v160_v0 = vmul.f32 -10.0, %v154_v55 }
  0x66   :  { %v81_v25 = vpop.permute.xlu2 %80 }
  0x67   :  { %v83_v26 = vperm.slane %v81_v25, 0  ;;  %v170_v9 = vmul.f32 1.442695, %v160_v0 }
  0x69   :  { %v89_v28 = vsub.f32 %v53_v27, %v83_v26 }
  0x6b   :  { %v155_v29 = vmul.f32 %v89_v28, %v89_v28 }
  0x6d   :  { %v161_v34 = vmul.f32 -10.0, %v155_v29 }
  0x6f   :  { %v172_v40 = vmul.f32 1.442695, %v161_v34 }
  0x71   :  { %335 = vpow2.f32 %v172_v40 }
  0x72   :  { %v451_v30 = vpop.permute.xlu2 %186 }
  0x74   :  { %v66_v31 = vpop.permute.xlu1 %65 }
  0x75   :  { %v68_v32 = vperm.slane %v66_v31, 0  ;;  %v56_v33 = vpop.permute.xlu0 %55 }
  0x76   :  { %v58_v35 = vperm.slane %v56_v33, 0 }
  0x77   :  { %v86_v36 = vsub.f32 %v53_v27, %v68_v32  ;;  %v336_v58 = vpop.eup %335 }
  0x78   :  { %v84_v37 = vsub.f32 %v53_v27, %v58_v35  ;;  %v245_v1 = vperm.slane %v336_v58, 0 }
  0x79   :  { %v152_v38 = vmul.f32 %v86_v36, %v86_v36 }
  0x7a   :  { %v150_v41 = vmul.f32 %v84_v37, %v84_v37  ;;  %v197_v44 = vpop.permute.xlu2 %196 }
  0x7b   :  { %v158_v42 = vmul.f32 -10.0, %v152_v38 }
  0x7c   :  { %v156_v43 = vmul.f32 -10.0, %v150_v41  ;;  %v71_v45 = vpop.permute.xlu1 %70 }
  0x7d   :  { %v166_v46 = vmul.f32 1.442695, %v158_v42  ;;  %v73_v47 = vperm.slane %v71_v45, 0  ;;  %v61_v48 = vpop.permute.xlu0 %60 }
  0x7e   :  { %v162_v50 = vmul.f32 1.442695, %v156_v43  ;;  %v63_v51 = vperm.slane %v61_v48, 0 }
  0x7f   :  { %337 = vpow2.f32 %v166_v46  ;;  %v87_v52 = vsub.f32 %v53_v27, %v73_v47 }
  0x80   :  { %v85_v53 = vsub.f32 %v53_v27, %v63_v51  ;;  %339 = vpow2.f32 %v162_v50 }
  0x81   :  { %v153_v54 = vmul.f32 %v87_v52, %v87_v52 }
  0x82   :  { %v151_v56 = vmul.f32 %v85_v53, %v85_v53  ;;  %v212_v60 = vpop.permute.xlu2 %211 }
  0x83   :  { %v159_v57 = vmul.f32 -10.0, %v153_v54 }
  0x84   :  { %v157_v59 = vmul.f32 -10.0, %v151_v56 }
  0x85   :  { %v338_v61 = vpop.eup %337  ;;  %v168_v62 = vmul.f32 1.442695, %v159_v57 }
  0x86   :  { %v340_v63 = vpop.eup %339  ;;  %v242_v2 = vperm.slane %v338_v61, 0  ;;  %v164_v3 = vmul.f32 1.442695, %v157_v59 }
  0x87   :  { %341 = vpow2.f32 %v168_v62  ;;  %v240_v4 = vperm.slane %v340_v63, 0  ;;  %v177_v6 = vpop.permute.xlu0 %176 }
  0x88   :  { %v256_v5 = vmul.f32 %v242_v2, %v197_v44  ;;  %343 = vpow2.f32 %v164_v3  ;;  %v182_v7 = vpop.permute.xlu1 %181 }
  0x89   :  { %v252_v8 = vmul.f32 %v240_v4, %v177_v6  ;;  %v253_v10 = vmul.f32 %v240_v4, %v182_v7  ;;  %345 = vpow2.f32 %v170_v9 }
  0x8a   :  { %268 = vst [vmem:[#allocation2 + $0x20] sm:$0xff] %v256_v5  ;;  %v227_v11 = vpop.permute.xlu2 %226 }
  0x8b   :  { %264 = vst [vmem:[#allocation2] sm:$0xff] %v252_v8  ;;  %v262_v13 = vmul.f32 %v245_v1, %v227_v11 }
  0x8c   :  { %265 = vst [vmem:[#allocation2 + $0x8] sm:$0xff] %v253_v10 }
  0x8d   :  { %v342_v12 = vpop.eup %341  ;;  %274 = vst [vmem:[#allocation2 + $0x50] sm:$0xff] %v262_v13 }
  0x8e   :  { %v344_v14 = vpop.eup %343  ;;  %v243_v15 = vperm.slane %v342_v12, 0 }
  0x8f   :  { %v241_v16 = vperm.slane %v344_v14, 0  ;;  %v202_v18 = vpop.permute.xlu0 %201  ;;  %v346_v23 = vpop.eup %345 }
  0x90   :  { %v259_v17 = vmul.f32 %v243_v15, %v212_v60  ;;  %v192_v20 = vpop.permute.xlu1 %191  ;;  %v257_v21 = vmul.f32 %v242_v2, %v202_v18  ;;  %v244_v24 = vperm.slane %v346_v23, 0 }
  0x91   :  { %v254_v19 = vmul.f32 %v241_v16, %v451_v30  ;;  %v255_v22 = vmul.f32 %v241_v16, %v192_v20 }
  0x92   :  { %271 = vst [vmem:[#allocation2 + $0x38] sm:$0xff] %v259_v17 }
  0x93   :  { %266 = vst [vmem:[#allocation2 + $0x10] sm:$0xff] %v254_v19 }
  0x94   :  { %267 = vst [vmem:[#allocation2 + $0x18] sm:$0xff] %v255_v22 }
  0x95   :  { %269 = vst [vmem:[#allocation2 + $0x28] sm:$0xff] %v257_v21 }
  0x97   :  { %v217_v25 = vpop.permute.xlu0 %216 }
  0x98   :  { %v207_v26 = vpop.permute.xlu1 %206  ;;  %v260_v27 = vmul.f32 %v244_v24, %v217_v25 }
  0x99   :  { %v258_v28 = vmul.f32 %v243_v15, %v207_v26 }
  0x9a   :  { %272 = vst [vmem:[#allocation2 + $0x40] sm:$0xff] %v260_v27 }
  0x9b   :  { %270 = vst [vmem:[#allocation2 + $0x30] sm:$0xff] %v258_v28 }
  0x9f   :  { %v232_v29 = vpop.permute.xlu0 %231 }
  0xa0   :  { %v222_v30 = vpop.permute.xlu1 %221  ;;  %v263_v31 = vmul.f32 %v245_v1, %v232_v29 }
  0xa1   :  { %v261_v32 = vmul.f32 %v244_v24, %v222_v30 }
  0xa2   :  { %275 = vst [vmem:[#allocation2 + $0x58] sm:$0xff] %v263_v31 }
  0xa3   :  { %273 = vst [vmem:[#allocation2 + $0x48] sm:$0xff] %v261_v32 }
  0xa4   :  { %288 = dma.vmem_to_hbm [thread:$0]  %s281_s13, 1536, %s283_s16, [#allocation3], %s376_s17, %s376_s17, %s377_s18  }
  0xa5   :  { %371 = dma.done.wait [#allocation3], 1536  }
  0xa6   :  { %372 = vsyncadd [#allocation3], 4294965760 }
  0xa7   :  { %293 = vsyncpa [#allocation3], 1 }

</bundles_post_ra>
